<compile_context>
chip_gen: v5e
topology: v5e:2x2
jax: 0.10.0
libtpu: 0.0.40
codegen_flags: <defaults>
</compile_context>

<pallas_src>
import jax
import jax.numpy as jnp
from jax.experimental import pallas as pl
from jax.experimental.pallas import tpu as pltpu


def make_position_encoding(max_len: int = 1024, d_model: int = 512,
                           dtype=jnp.float32) -> jnp.ndarray:
    """Replicates the PyTorch __init__ buffer exactly. Shape (1, max_len, d_model)."""
    if d_model % 2 != 0:
        raise ValueError("d_model must be even (matches the PyTorch module).")
    position = jnp.arange(max_len, dtype=jnp.float32)[:, None]          # (max_len, 1)
    embedding_index = jnp.arange(0, d_model, 2, dtype=jnp.float32)      # (d_model//2,)
    div_term = 1.0 / (jnp.float32(10000.0) ** (embedding_index / d_model))
    sin_part = jnp.sin(position * div_term)                             # (max_len, d//2)
    cos_part = jnp.cos(position * div_term)                             # (max_len, d//2)
    pe = jnp.zeros((max_len, d_model), dtype=jnp.float32)
    pe = pe.at[:, 0::2].set(sin_part)
    pe = pe.at[:, 1::2].set(cos_part)
    return pe[None, :, :].astype(dtype)                                 # (1, max_len, d_model)


def _add_pe_kernel(x_ref, pe_ref, o_ref):
    # Elementwise broadcast add; block shapes of x and pe always match by construction.
    o_ref[...] = x_ref[...] + pe_ref[...]


_TARGET_BLOCK_BYTES = 2 << 20   # ~2 MiB/block -> ~12 MiB live with 3 double-buffered streams


def _vmem_limit(block_bytes: int) -> int:
    # 2 inputs + 1 output, double-buffered ~= 6x block bytes, plus margin. Keep within
    # v7x's 64 MiB physical VMEM and above v5e's 16 MiB default scoped limit.
    return int(min(64 * 1024 * 1024, max(32 * 1024 * 1024, 8 * block_bytes)))


def position_encoding_forward(word_embeddings: jnp.ndarray, pe: jnp.ndarray,
                              *, target_block_bytes: int = _TARGET_BLOCK_BYTES) -> jnp.ndarray:
    """word_embeddings: (B, S, D); pe: (1, max_len, D). Returns (B, S, D)."""
    B, S, D = word_embeddings.shape
    _, max_len, d_model = pe.shape
    if D != d_model:
        raise ValueError(f"d_model mismatch: x has {D}, pe has {d_model}")
    if S > max_len:
        raise ValueError(f"sequence length {S} exceeds max_len {max_len}")
    if pe.dtype != word_embeddings.dtype:
        # Keep the whole op at the activation dtype (e.g. bf16 end-to-end halves HBM traffic).
        pe = pe.astype(word_embeddings.dtype)
    itemsize = word_embeddings.dtype.itemsize

    if D % 128 == 0:
        # ---- primary path: lane-dense D, tile the sequence axis ----
        rows = max(8, min(1024, (target_block_bytes // (D * itemsize)) // 8 * 8))
        TS = S if S <= rows else rows
        if TS % 8 == 0:
            # Pass the full PE buffer; the BlockSpec DMA reads exactly the rows needed.
            pe_in = pe
            pe_map = lambda s, b: (0, s, 0)
        else:
            # Tiny, non-sublane-aligned S: a full-extent block needs a pre-sliced view.
            pe_in = pe[:, :S, :]
            pe_map = lambda s, b: (0, 0, 0)
        grid = (pl.cdiv(S, TS), B)          # batch innermost -> PE block reused across batch
        block_bytes = TS * D * itemsize
        return pl.pallas_call(
            _add_pe_kernel,
            out_shape=jax.ShapeDtypeStruct((B, S, D), word_embeddings.dtype),
            grid_spec=pltpu.PrefetchScalarGridSpec(
                num_scalar_prefetch=0,
                grid=grid,
                in_specs=[
                    pl.BlockSpec((1, TS, D), lambda s, b: (b, s, 0)),   # per-batch S-tile of x
                    pl.BlockSpec((1, TS, D), pe_map),                   # shared PE S-tile
                ],
                out_specs=pl.BlockSpec((1, TS, D), lambda s, b: (b, s, 0)),
            ),
            compiler_params=pltpu.CompilerParams(
                dimension_semantics=("parallel", "parallel"),
                vmem_limit_bytes=_vmem_limit(block_bytes),
            ),
        )(word_embeddings, pe_in)

    # ---- fallback path: D not a multiple of 128 -> flatten (S, D) into a lane-dense axis ----
    L = S * D
    x_flat = word_embeddings.reshape(B, 1, L)            # contiguous reshape (free)
    if L % 128 == 0:
        lanes = max(128, (target_block_bytes // itemsize) // 128 * 128)
        TL = min(L, lanes)
        # Flattened full PE buffer: row-major layout matches x_flat, so the same lane
        # block index selects exactly rows [0, S) of PE. No wrapper slice copy.
        pe_in = pe.reshape(1, 1, max_len * D)
        pe_map = lambda l, b: (0, 0, l)
    else:
        # Tiny, non-128-aligned total: single full-extent block with a pre-sliced PE view.
        TL = L
        pe_in = pe[:, :S, :].reshape(1, 1, L)
        pe_map = lambda l, b: (0, 0, 0)
    grid = (pl.cdiv(L, TL), B)              # batch innermost -> PE block reused across batch
    block_bytes = TL * itemsize
    out = pl.pallas_call(
        _add_pe_kernel,
        out_shape=jax.ShapeDtypeStruct((B, 1, L), word_embeddings.dtype),
        grid_spec=pltpu.PrefetchScalarGridSpec(
            num_scalar_prefetch=0,
            grid=grid,
            in_specs=[
                pl.BlockSpec((1, 1, TL), lambda l, b: (b, 0, l)),
                pl.BlockSpec((1, 1, TL), pe_map),
            ],
            out_specs=pl.BlockSpec((1, 1, TL), lambda l, b: (b, 0, l)),
        ),
        compiler_params=pltpu.CompilerParams(
            dimension_semantics=("parallel", "parallel"),
            vmem_limit_bytes=_vmem_limit(block_bytes),
        ),
    )(x_flat, pe_in)
    return out.reshape(B, S, D)


if __name__ == "__main__":
    key = jax.random.PRNGKey(0)

    # Case 1: small demo shapes consistent with the module's forward (batch, seq, d_model).
    # d_model=32 < 128 exercises the lane-flattened path.
    B, S, D, MAX_LEN = 2, 8, 32, 1024
    x = jax.random.normal(key, (B, S, D), dtype=jnp.float32)
    pe = make_position_encoding(max_len=MAX_LEN, d_model=D)
    out = jax.block_until_ready(position_encoding_forward(x, pe))
    ref = x + pe[:, :S, :]
    assert out.shape == (B, S, D)
    assert jnp.allclose(out, ref, atol=1e-6, rtol=1e-6)

    # Case 2: lane-aligned d_model, multiple S-tiles incl. a partial last tile
    # (exercises the primary path and PE-block reuse across the batch axis).
    B2, S2, D2, MAX_LEN2 = 2, 40, 256, 64
    key2 = jax.random.fold_in(key, 1)
    x2 = jax.random.normal(key2, (B2, S2, D2), dtype=jnp.float32)
    pe2 = make_position_encoding(max_len=MAX_LEN2, d_model=D2)
    # Small target block size just to force several sequence tiles at demo shapes.
    out2 = jax.block_until_ready(
        position_encoding_forward(x2, pe2, target_block_bytes=16 * D2 * 4))
    ref2 = x2 + pe2[:, :S2, :]
    assert out2.shape == (B2, S2, D2)
    assert jnp.allclose(out2, ref2, atol=1e-6, rtol=1e-6)

    print("KERNEL_OK")
</pallas_src>

<mosaic_0001>
module attributes {stable_mosaic.version = 11 : i64} {
  func.func @_add_pe_kernel(%arg0: i32, %arg1: i32, %arg2: memref<1x1x256xf32, #tpu.memory_space<vmem>>, %arg3: memref<1x1x256xf32, #tpu.memory_space<vmem>>, %arg4: memref<1x1x256xf32, #tpu.memory_space<vmem>>) attributes {dimension_semantics = [#tpu.dimension_semantics<parallel>, #tpu.dimension_semantics<parallel>], iteration_bounds = array<i64: 1, 2>, scalar_prefetch = 0 : i64, scratch_operands = 0 : i64, tpu.core_type = #tpu.core_type<tc>, window_params = [{transform_indices = @transform_0, window_bounds = array<i64: 1, 1, 256>}, {transform_indices = @transform_1, window_bounds = array<i64: 1, 1, 256>}, {transform_indices = @transform_2, window_bounds = array<i64: 1, 1, 256>}]} {
    %c0 = arith.constant 0 : index
    %c0_0 = arith.constant 0 : index
    %c0_1 = arith.constant 0 : index
    %0 = vector.load %arg2[%c0, %c0_0, %c0_1] : memref<1x1x256xf32, #tpu.memory_space<vmem>>, vector<1x1x256xf32>
    %c0_2 = arith.constant 0 : index
    %c0_3 = arith.constant 0 : index
    %c0_4 = arith.constant 0 : index
    %1 = vector.load %arg3[%c0_2, %c0_3, %c0_4] : memref<1x1x256xf32, #tpu.memory_space<vmem>>, vector<1x1x256xf32>
    %2 = arith.addf %0, %1 : vector<1x1x256xf32>
    %c0_5 = arith.constant 0 : index
    %c0_6 = arith.constant 0 : index
    %c0_7 = arith.constant 0 : index
    %3 = vector.load %arg4[%c0_5, %c0_6, %c0_7] : memref<1x1x256xf32, #tpu.memory_space<vmem>>, vector<1x1x256xf32>
    tpu.vector_store %arg4[%c0_5, %c0_6, %c0_7], %2 {strides = array<i32>} : memref<1x1x256xf32, #tpu.memory_space<vmem>>, vector<1x1x256xf32>,
    return
  }
  func.func @transform_0(%arg0: i32, %arg1: i32) -> (i32, i32, i32) {
    %c0_i32 = arith.constant 0 : i32
    %c0_i32_0 = arith.constant 0 : i32
    return %arg1, %c0_i32, %arg0 : i32, i32, i32
  }
  func.func @transform_1(%arg0: i32, %arg1: i32) -> (i32, i32, i32) {
    %c0_i32 = arith.constant 0 : i32
    %c0_i32_0 = arith.constant 0 : i32
    %c0_i32_1 = arith.constant 0 : i32
    return %c0_i32, %c0_i32_0, %arg0 : i32, i32, i32
  }
  func.func @transform_2(%arg0: i32, %arg1: i32) -> (i32, i32, i32) {
    %c0_i32 = arith.constant 0 : i32
    %c0_i32_0 = arith.constant 0 : i32
    return %arg1, %c0_i32, %arg0 : i32, i32, i32
  }
}

</mosaic_0001>

<bundles_post_ra>
// kernel: tpu_custom_call.1
= control target key start
LH: loop header
LB: loop body
LE: loop exit
PB: predicated region body
PF: predicated region fallthrough
CT: control target
= control target key end

     0   :  { %7 = vsyncpa [#allocation3], 0  ;;  %s725_s0 = inlined_call_operand.hbm [shape: f32[2,1,256], index: 0, kind: input, shape index: {}]   ;;  %s726_s1 = inlined_call_operand.hbm [shape: f32[1,1,32768], index: 1, kind: input, shape index: {}]   ;;  %s727_s2 = inlined_call_operand.hbm [shape: f32[2,1,256], index: 2, kind: output, shape index: {}]  }
   0x1   :  { %9 = vsyncpa [#allocation3 + $0x1], 0 }
   0x2   :  { %10 = vsyncpa [#allocation6], 0 }
   0x3   :  { %11 = vsyncpa [#allocation4], 0 }
   0x4   :  { %13 = vsyncpa [#allocation4 + $0x1], 0  ;;  %s576_s9 = smov 0   ;;  %s578_s10 = smov 0  }
   0x5   :  { %s580_s11 = smov 0   ;;  %s582_s12 = smov 0  }
   0x6   :  { %s584_s13 = smov 0   ;;  %s586_s14 = smov 0  }
   0x7 LB: > { %s324_s15 = sadd.s32 4294967295, %s558_s14   ;;  %s325_s16 = sadd.s32 4294967294, %s558_s14   ;;  %s558_s14 = sphi %s586_s14, %s19_s14   ;;  %s554_s13 = sphi %s584_s13, %s739_s13   ;;  %s550_s12 = sphi %s582_s12, %s738_s12   ;;  %s546_s11 = sphi %s580_s11, %s737_s11   ;;  %s542_s10 = sphi %s578_s10, %s736_s10   ;;  %s538_s9 = sphi %s576_s9, %s735_s9  }
   0x8   : > { %p53_p0 = scmp.ne.s32.totalorder %s542_s10, %s538_s9  ;;  %p610_p1 = scmp.eq.s32.totalorder %s324_s15, 0 }
   0x9   : > { %p614_p2 = scmp.eq.s32.totalorder %s324_s15, 1  ;;  %p111_p3 = scmp.eq.s32.totalorder %s325_s16, 1 }
   0xa   : > { %p620_p4 = por %p610_p1, %p53_p0  ;;  %p326_p5 = scmp.ge.s32.totalorder %s558_s14, 1 }
   0xb   : > { %p625_p6 = por %p111_p3, %p53_p0  ;;  %p118_p7 = scmp.lt.s32.totalorder %s558_s14, 3 }
   0xc   : > { %s132_s23 = sshll.u32 %s726_s1, 4  ;;  %p328_p9 = scmp.ge.s32.totalorder %s558_s14, 2  ;;  %s133_s23 = int_to_ptr.hbm [resolvable:$true] %s132_s23 }
   0xd   : > { %p633_p8 = pnand %p326_p5, %p118_p7  ;;  %s560_s25 = smov [#allocation5]  }
   0xe   : > { %s134_s26 = sshll.u32 %s560_s25, 4  ;;  %s28_s27 = sadd.s32 1, %s554_s13  ;;  %s135_s26 = int_to_ptr.vmem [resolvable:$true] %s134_s26 }
   0xf   : > { %p347_p10 = pneg %p633_p8  ;;  %p29_p12 = scmp.ge.s32.totalorder %s28_s27, 2 }
  0x10   : > { %s40_s28 = sadd.s32 1, %s546_s11  ;;  %p47_p13 = scmp.ne.s32.totalorder %s546_s11, %s542_s10 }
  0x11   : > { %p348_p11 = pnand %p347_p10, %p610_p1  ;;  %p48_p0 = scmp.eq.s32.totalorder %s558_s14, 0 }
  0x12   : > { %s741_s27 = smov (%p29_p12, %s28_s27), 0  ;;  %p655_p5 = por %p614_p2, %p47_p13 }
  0x13   : > { %350 = dma.hbm_to_vmem [thread:$0]  (!%p348_p11), %s133_s23, 32, %s135_s26, [#allocation6]  }
  0x14   : > { %p649_p3 = por %p48_p0, %p47_p13  ;;  %s35_s3 = ssub.s32 %s554_s13, %s741_s27 }
  0x15   : > { %p360_p7 = scmp.lt.s32.totalorder %s558_s14, 2  ;;  %p38_p10 = scmp.eq.s32.totalorder %s35_s3, 0 }
  0x16   : > { %s145_s4 = sand.u32 1, %s546_s11   ;;  %s330_s7 = sshll.u32 %s554_s13, 1 }
  0x17   : > { %s329_s5 = sshll.u32 %s145_s4, 1  ;;  %s155_s16 = scalar_lea.hbm %s725_s0, %s330_s7 }
  0x18   : > { %s664_s6 = scalar_select %p38_p10, %s546_s11, %s40_s28  }
  0x19   : > { %s149_s21 = scalar_lea.vmem [#allocation2], %s329_s5  ;;  %s157_s18 = sshll.u32 %s155_s16, 4  ;;  %s158_s18 = int_to_ptr.hbm [resolvable:$true] %s157_s18 }
  0x1a   : > { %s159_s22 = sshll.u32 %s149_s21, 4  ;;  %p352_p2 = pnand %p360_p7, %p649_p3  ;;  %s160_s22 = int_to_ptr.vmem [resolvable:$true] %s159_s22 }
  0x1b   : > { %s146_s23 = scalar_lea.sflag [#allocation3], %s145_s4  ;;  %168 = sbr.rel (%p633_p8) target bundleno = 50 (0x32), region = 28 }
  0x1c   : > { %354 = dma.hbm_to_vmem [thread:$0]  (!%p352_p2), %s158_s18, 32, %s160_s22, %s146_s23  }
  0x1d   : > { %s675_s25 = sand.u32 (!%p633_p8), 1, %s542_s10  }
  0x1e   : > { %s332_s26 = sshll.u32 (!%p633_p8), %s675_s25, 1  ;;  %s171_s28 = scalar_lea.sflag (!%p633_p8), [#allocation3], %s675_s25 }
  0x1f   : > { %s174_s3 = scalar_lea.vmem (!%p633_p8), [#allocation2], %s332_s26 }
  0x20   : > { %525 = dma.done.wait (%p620_p4), %s171_s28, 32  }
  0x21   : > { %527 = vsyncadd (%p620_p4), %s171_s28, 4294967264 }
  0x22   : > { %529 = dma.done.wait (%p610_p1), [#allocation6], 32  }
  0x23   : > { %531 = vsyncadd (%p610_p1), [#allocation6], 4294967264  ;;  %s336_s24 = sshll.u32 %s550_s12, 1  ;;  %v207_v0 = vlaneseq  ;;  %s200_s7 = scalar_lea.vmem [#allocation7], %s332_s26  ;;  %v204_v1 = vld [vmem:[%s174_s3] sm:$0x3] }
  0x24   : > { %s225_s5 = scalar_lea.hbm %s727_s2, %s336_s24  ;;  %s227_s8 = sshll.u32 %s200_s7, 4  ;;  %v205_v2 = vld [vmem:[#allocation5] sm:$0x3]  ;;  %s228_s8 = int_to_ptr.vmem [resolvable:$true] %s227_s8 }
  0x25   : > { %s229_s15 = sshll.u32 %s225_s5, 4  ;;  %vm209_vm0 = vcmp.lt.s32.totalorder %v207_v0, 256  ;;  %v206_v3 = vadd.f32 %v205_v2, %v204_v1  ;;  %s213_s17 = scalar_lea.sflag [#allocation4], %s675_s25  ;;  %s230_s15 = int_to_ptr.hbm [resolvable:$true] %s229_s15 }
  0x26   : > { %s486_s19 = sshra.s32 %s230_s15, 4  ;;  %s492_s22 = scalar_lea.hbm %s727_s2, 4  ;;  %s487_s19 = int_to_ptr.hbm [resolvable:$true] %s486_s19 }
  0x27   : > { %211 = vst.msk [vmem:[%s200_s7] sm:$0x3] %vm209_vm0, %v206_v3  ;;  %s488_s12 = scalar_lea.hbm %s487_s19, 2  ;;  %p493_p11 = scmp.lt.s32.totalorder %s487_s19, %s727_s2 }
  0x28   : > { %p489_p1 = scmp.ne.s32.totalorder %s487_s19, %s488_s12  ;;  %p494_p12 = scmp.lt.s32.totalorder %s492_s22, %s488_s12 }
  0x2a   : > { %p490_p4 = pnand %p489_p1, %p655_p5  ;;  %p495_p13 = por %p494_p12, %p493_p11 }
  0x2c   : > { %p491_p8 = pneg %p490_p4 }
  0x2e   : > { %p496_p0 = pnand %p495_p13, %p491_p8 }
  0x30   : > { %499 = shalt.err (!%p496_p0)
}
  0x31   : > { %345 = dma.vmem_to_hbm [thread:$0]  (%p655_p5), %s228_s8, 32, %s230_s15, %s213_s17  }
  0x32 PF: > { %s241_s25 = sand.u32 1, %s538_s9   ;;  %p356_p3 = pnand %p328_p9, %p625_p6 }
  0x33   : > { %s242_s26 = scalar_lea.sflag [#allocation4], %s241_s25 }
  0x34   : > { %p357_p7 = pneg %p356_p3 }
  0x36   : > { %533 = dma.done.wait (%p357_p7), %s242_s26, 32  }
  0x37   : > { %535 = vsyncadd (%p357_p7), %s242_s26, 4294967264  ;;  %s19_s14 = sadd.s32 1, %s558_s14   ;;  %s735_s9 = smov %s542_s10 }
  0x38   : > { %p16_p10 = scmp.ge.s32.totalorder %s19_s14, 4   ;;  %s736_s10 = smov %s546_s11 }
  0x39   : > { %s737_s11 = smov %s664_s6  ;;  %s738_s12 = smov %s554_s13 }
  0x3a   : > { %s739_s13 = smov %s741_s27  ;;  %18 = sbr.rel (!%p16_p10) target bundleno = 7 (0x7), region = 78 }
  0x3f   :  { %248 = vsyncpa [#allocation3], 1 }
  0x40   :  { %250 = vsyncpa [#allocation3 + $0x1], 1 }
  0x41   :  { %251 = vsyncpa [#allocation6], 1 }
  0x42   :  { %252 = vsyncpa [#allocation4], 1 }
  0x43   :  { %254 = vsyncpa [#allocation4 + $0x1], 1 }

</bundles_post_ra>
